<compile_context>
chip_gen: v7x
topology: tpu7x:2x2x1
jax: 0.10.0
libtpu: 0.0.40
codegen_flags: <defaults>
</compile_context>

<pallas_src>
import functools

import numpy as np
import jax
import jax.numpy as jnp
from jax.experimental import pallas as pl
from jax.experimental.pallas import tpu as pltpu


# ---------------------------------------------------------------------------
# VMEM budget (per generation)
# ---------------------------------------------------------------------------
def _vmem_budget_bytes():
    cap = 64 * 1024 * 1024  # conservative default (v7x-sized) if query fails
    try:
        info = pltpu.get_tpu_info()
        cap = int(getattr(info, "vmem_capacity_bytes", cap))
    except Exception:
        pass
    # leave headroom: 75% of physical, capped at 96 MiB
    return min((cap * 3) // 4, 96 * 1024 * 1024)


# ---------------------------------------------------------------------------
# Fused whole-model kernel: everything resident in VMEM, all layers in one call
# ---------------------------------------------------------------------------
def _fused_gcn_kernel(adj_ref, h_ref, w_ref, b_ref, o_ref, *, num_layers):
    a = adj_ref[...]                      # (N, N) bf16, resident
    h = h_ref[...]                        # (N, D) bf16
    for l in range(num_layers):           # static unroll over layers
        hw = jnp.dot(h, w_ref[l], preferred_element_type=jnp.float32)
        hw = hw.astype(jnp.bfloat16)
        y = jnp.dot(a, hw, preferred_element_type=jnp.float32) + b_ref[l]
        y = jnp.maximum(y, 0.0)
        if l + 1 < num_layers:
            h = y.astype(jnp.bfloat16)
        else:
            o_ref[...] = y.astype(o_ref.dtype)


def fused_gcn_forward(adj_bf16, h_bf16, w_stack, b_stack, *, vmem_budget):
    n = adj_bf16.shape[0]
    d = h_bf16.shape[1]
    num_layers = w_stack.shape[0]
    kernel = functools.partial(_fused_gcn_kernel, num_layers=num_layers)
    return pl.pallas_call(
        kernel,
        out_shape=jax.ShapeDtypeStruct((n, d), jnp.float32),
        grid_spec=pltpu.PrefetchScalarGridSpec(
            num_scalar_prefetch=0,
            grid=(1,),
            in_specs=[
                pl.BlockSpec((n, n), lambda i: (0, 0)),
                pl.BlockSpec((n, d), lambda i: (0, 0)),
                pl.BlockSpec((num_layers, d, d), lambda i: (0, 0, 0)),
                pl.BlockSpec((num_layers, 1, d), lambda i: (0, 0, 0)),
            ],
            out_specs=pl.BlockSpec((n, d), lambda i: (0, 0)),
        ),
        compiler_params=pltpu.CompilerParams(
            dimension_semantics=("arbitrary",),
            vmem_limit_bytes=vmem_budget,
        ),
    )(adj_bf16, h_bf16, w_stack, b_stack)


# ---------------------------------------------------------------------------
# Tiled matmul kernels (large-graph path):  out = act(a @ b + bias)
# ---------------------------------------------------------------------------
def _matmul_flat_kernel(a_ref, b_ref, bias_ref, o_ref, *, relu):
    # Right operand fully resident: one dot, no accumulator, no phase branches.
    y = jnp.dot(a_ref[...], b_ref[...], preferred_element_type=jnp.float32)
    y = y + bias_ref[...]
    if relu:
        y = jnp.maximum(y, 0.0)
    o_ref[...] = y.astype(o_ref.dtype)


def _matmul_acc_kernel(a_ref, b_ref, bias_ref, o_ref, acc_ref, *, relu):
    k = pl.program_id(2)

    @pl.when(k == 0)
    def _init():
        acc_ref[...] = jnp.zeros_like(acc_ref)

    acc_ref[...] += jnp.dot(
        a_ref[...], b_ref[...], preferred_element_type=jnp.float32
    )

    @pl.when(k == pl.num_programs(2) - 1)
    def _finalize():
        y = acc_ref[...] + bias_ref[...]
        if relu:
            y = jnp.maximum(y, 0.0)
        o_ref[...] = y.astype(o_ref.dtype)


def _pick_div(dim, prefs):
    for p in prefs:
        if dim % p == 0:
            return p
    return dim


def matmul_bias_act(a, b, bias, *, relu, out_dtype):
    """act(a @ b + bias). a, b already bf16; all dims multiples of 128."""
    m, k = a.shape
    k2, n = b.shape
    assert k == k2 and bias.shape == (1, n)
    assert m % 128 == 0 and k % 128 == 0 and n % 128 == 0
    assert a.dtype == jnp.bfloat16 and b.dtype == jnp.bfloat16

    budget = _vmem_budget_bytes()
    out_sz = jnp.dtype(out_dtype).itemsize
    tn = n if n <= 512 else _pick_div(n, (512, 256, 128))

    # ---- preferred: flat path, RHS fully resident (k grid axis collapsed) ----
    def flat_bytes(tm):
        return (2 * tm * k * 2        # A tile (double buffered)
                + 2 * k * tn * 2      # resident RHS (conservative x2)
                + 2 * tm * tn * out_sz
                + 2 * tn * 4)

    tm = None
    for t in (1024, 512, 256, 128):
        if m % t:
            continue
        if m > 128 and m // t < 2:    # keep >= 2 'parallel' i steps (v7x cores)
            continue
        if flat_bytes(t) <= budget:
            tm = t
            break

    if tm is not None:
        return pl.pallas_call(
            functools.partial(_matmul_flat_kernel, relu=relu),
            out_shape=jax.ShapeDtypeStruct((m, n), out_dtype),
            grid_spec=pltpu.PrefetchScalarGridSpec(
                num_scalar_prefetch=0,
                grid=(m // tm, n // tn),
                in_specs=[
                    pl.BlockSpec((tm, k), lambda i, j: (i, 0)),
                    pl.BlockSpec((k, tn), lambda i, j: (0, j)),  # resident RHS
                    pl.BlockSpec((1, tn), lambda i, j: (0, j)),
                ],
                out_specs=pl.BlockSpec((tm, tn), lambda i, j: (i, j)),
            ),
            compiler_params=pltpu.CompilerParams(
                dimension_semantics=("parallel", "parallel"),
                vmem_limit_bytes=budget,
            ),
        )(a, b, bias)

    # ---- fallback: (i, j, k) accumulator path for very large K ----
    def acc_bytes(t_m, t_k):
        return (2 * t_m * t_k * 2 + 2 * t_k * tn * 2
                + 2 * t_m * tn * out_sz + t_m * tn * 4 + 2 * tn * 4)

    chosen = None
    for t_m in (512, 256, 128):
        if m % t_m:
            continue
        if m > 128 and m // t_m < 2:
            continue
        for t_k in (2048, 1024, 512, 256, 128):
            if k % t_k:
                continue
            if acc_bytes(t_m, t_k) <= budget:
                chosen = (t_m, t_k)
                break
        if chosen is not None:
            break
    tm, tk = chosen if chosen is not None else (128, 128)

    return pl.pallas_call(
        functools.partial(_matmul_acc_kernel, relu=relu),
        out_shape=jax.ShapeDtypeStruct((m, n), out_dtype),
        grid_spec=pltpu.PrefetchScalarGridSpec(
            num_scalar_prefetch=0,
            grid=(m // tm, n // tn, k // tk),
            in_specs=[
                pl.BlockSpec((tm, tk), lambda i, j, kk: (i, kk)),
                pl.BlockSpec((tk, tn), lambda i, j, kk: (kk, j)),
                pl.BlockSpec((1, tn), lambda i, j, kk: (0, j)),
            ],
            out_specs=pl.BlockSpec((tm, tn), lambda i, j, kk: (i, j)),
            scratch_shapes=[pltpu.VMEM((tm, tn), jnp.float32)],
        ),
        compiler_params=pltpu.CompilerParams(
            dimension_semantics=("parallel", "parallel", "arbitrary"),
            vmem_limit_bytes=budget,
        ),
    )(a, b, bias)


# ---------------------------------------------------------------------------
# Parameter / adjacency setup (host-side glue)
# ---------------------------------------------------------------------------
def _ceil_to(x, m):
    return ((x + m - 1) // m) * m


def normalize_adjacent_matrix_co(adj_np):
    """'co' normalization: binarize, add self loops, D^{-1} A (row-normalize)."""
    a = np.array(adj_np, dtype=np.float32)
    a[a > 0] = 1.0
    np.fill_diagonal(a, 1.0)
    d = a.sum(1)                          # self-loops guarantee d > 0
    return (a * (1.0 / d)[:, None]).astype(np.float32)   # O(N^2) row scaling


def xavier_uniform(key, din, dout):
    # matches nn.init.xavier_uniform_ on a (dout, din) weight; returned as (din, dout)
    bound = float(np.sqrt(6.0 / (din + dout)))
    w_pt = jax.random.uniform(key, (dout, din), jnp.float32, -bound, bound)
    return w_pt.T


def _pad2d(x, rows, cols):
    r, c = x.shape
    return jnp.pad(x, ((0, rows - r), (0, cols - c)))


class GraphNetPallas:
    def __init__(self, num_nodes, d_model, num_layers, seed=0, force_tiled=False):
        key = jax.random.PRNGKey(seed)
        k_adj, k_emb, *k_layers = jax.random.split(key, 2 + num_layers)

        self.n = num_nodes
        self.d = d_model
        self.num_layers = num_layers
        self.force_tiled = force_tiled
        self.n_pad = _ceil_to(num_nodes, 128)
        self.d_pad = _ceil_to(d_model, 128)

        # deterministic synthetic co-occurrence matrix (in place of np.load)
        raw = np.asarray(
            jax.random.uniform(k_adj, (num_nodes, num_nodes), jnp.float32)
        )
        raw = (raw > 0.6).astype(np.float32) * raw  # sparsify
        raw = raw + raw.T                           # symmetric counts
        adj = jnp.asarray(normalize_adjacent_matrix_co(raw))
        # cast once to bf16 (MXU input dtype) -- no per-call converts later
        self.adj_bf16 = _pad2d(adj, self.n_pad, self.n_pad).astype(jnp.bfloat16)

        # nn.Embedding(len(ids), d_model) with weight.data.normal_(0, 1)
        embs = jax.random.normal(k_emb, (num_nodes, d_model), jnp.float32)
        self.embs_bf16 = _pad2d(embs, self.n_pad, self.d_pad).astype(jnp.bfloat16)

        # GCN layers: Linear(d_model, d_model), xavier_uniform weight, zero bias
        self.weights_bf16 = []
        self.biases_f32 = []
        for li in range(num_layers):
            w = xavier_uniform(k_layers[li], d_model, d_model)
            self.weights_bf16.append(
                _pad2d(w, self.d_pad, self.d_pad).astype(jnp.bfloat16))
            self.biases_f32.append(jnp.zeros((1, self.d_pad), jnp.float32))

        self.w_stack = jnp.stack(self.weights_bf16)          # (L, D, D) bf16
        self.b_stack = jnp.stack(self.biases_f32)            # (L, 1, D) f32
        self.zero_bias = jnp.zeros((1, self.d_pad), jnp.float32)

    def _fused_fits(self, budget):
        n, d, L = self.n_pad, self.d_pad, self.num_layers
        # inputs/outputs (conservatively x2) + in-kernel f32 temporaries
        est = (2 * (2 * n * n + 2 * n * d + 2 * L * d * d + 4 * L * d + 4 * n * d)
               + 16 * n * d)
        return est <= budget

    def __call__(self):
        budget = _vmem_budget_bytes()

        if (not self.force_tiled) and self._fused_fits(budget):
            # single fused kernel: A, H, all W/b resident; all layers in one call
            out = fused_gcn_forward(self.adj_bf16, self.embs_bf16,
                                    self.w_stack, self.b_stack,
                                    vmem_budget=budget)
            return out[: self.n, : self.d]

        # tiled path (large graphs / forced)
        h = self.embs_bf16
        for li in range(self.num_layers):
            last = li == self.num_layers - 1
            # prologue: HW = H @ W  (small; kept bf16 for the main matmul)
            hw = matmul_bias_act(h, self.weights_bf16[li], self.zero_bias,
                                 relu=False, out_dtype=jnp.bfloat16)
            # main pass: ReLU(A @ HW + b); intermediate layers emit bf16
            h = matmul_bias_act(self.adj_bf16, hw, self.biases_f32[li],
                                relu=True,
                                out_dtype=jnp.float32 if last else jnp.bfloat16)
        return h[: self.n, : self.d]


# ---------------------------------------------------------------------------
# Reference (pure JAX, identical bf16/f32 mixed-precision schedule) for checks
# ---------------------------------------------------------------------------
def reference_forward(model):
    a = model.adj_bf16
    h = model.embs_bf16
    L = model.num_layers
    for li in range(L):
        w = model.weights_bf16[li]
        b = model.biases_f32[li]
        hw = jnp.dot(h, w, preferred_element_type=jnp.float32).astype(jnp.bfloat16)
        y = jnp.dot(a, hw, preferred_element_type=jnp.float32) + b
        y = jnp.maximum(y, 0.0)
        h = y if li == L - 1 else y.astype(jnp.bfloat16)
    return h[: model.n, : model.d]


if __name__ == "__main__":
    NUM_NODES = 8     # number of active graph nodes (len(ids))
    D_MODEL = 32      # config.d_model
    NUM_LAYERS = 2    # config.gcn_num_layers

    # Toy shapes -> single fused kernel (whole problem resident in VMEM).
    model = GraphNetPallas(NUM_NODES, D_MODEL, NUM_LAYERS, seed=0)
    out = jax.block_until_ready(model())
    ref = reference_forward(model)
    assert out.shape == (NUM_NODES, D_MODEL)
    np.testing.assert_allclose(np.asarray(out), np.asarray(ref),
                               rtol=5e-3, atol=5e-3)

    # Also exercise the tiled / resident-RHS path used for large graphs.
    model_tiled = GraphNetPallas(NUM_NODES, D_MODEL, NUM_LAYERS, seed=1,
                                 force_tiled=True)
    out_t = jax.block_until_ready(model_tiled())
    ref_t = reference_forward(model_tiled)
    np.testing.assert_allclose(np.asarray(out_t), np.asarray(ref_t),
                               rtol=5e-3, atol=5e-3)

    print("KERNEL_OK")
</pallas_src>

<mosaic_0001>
module attributes {stable_mosaic.version = 11 : i64} {
  func.func @_fused_gcn_kernel(%arg0: i32, %arg1: memref<128x128xbf16, #tpu.memory_space<vmem>>, %arg2: memref<128x128xbf16, #tpu.memory_space<vmem>>, %arg3: memref<2x128x128xbf16, #tpu.memory_space<vmem>>, %arg4: memref<2x1x128xf32, #tpu.memory_space<vmem>>, %arg5: memref<128x128xf32, #tpu.memory_space<vmem>>) attributes {dimension_semantics = [#tpu.dimension_semantics<arbitrary>], iteration_bounds = array<i64: 1>, scalar_prefetch = 0 : i64, scratch_operands = 0 : i64, tpu.core_type = #tpu.core_type<tc>, window_params = [{pipeline_mode = #tpu.pipeline_mode<synchronous>, transform_indices = @transform_0, window_bounds = array<i64: 128, 128>}, {pipeline_mode = #tpu.pipeline_mode<synchronous>, transform_indices = @transform_1, window_bounds = array<i64: 128, 128>}, {pipeline_mode = #tpu.pipeline_mode<synchronous>, transform_indices = @transform_2, window_bounds = array<i64: 2, 128, 128>}, {pipeline_mode = #tpu.pipeline_mode<synchronous>, transform_indices = @transform_3, window_bounds = array<i64: 2, 1, 128>}, {pipeline_mode = #tpu.pipeline_mode<synchronous>, transform_indices = @transform_4, window_bounds = array<i64: 128, 128>}]} {
    %c0 = arith.constant 0 : index
    %c0_0 = arith.constant 0 : index
    %0 = vector.load %arg1[%c0, %c0_0] : memref<128x128xbf16, #tpu.memory_space<vmem>>, vector<128x128xbf16>
    %c0_1 = arith.constant 0 : index
    %c0_2 = arith.constant 0 : index
    %1 = vector.load %arg2[%c0_1, %c0_2] : memref<128x128xbf16, #tpu.memory_space<vmem>>, vector<128x128xbf16>
    %c0_3 = arith.constant 0 : index
    %c0_4 = arith.constant 0 : index
    %c0_5 = arith.constant 0 : index
    %2 = vector.load %arg3[%c0_3, %c0_4, %c0_5] : memref<2x128x128xbf16, #tpu.memory_space<vmem>>, vector<1x128x128xbf16>
    %3 = vector.shape_cast %2 : vector<1x128x128xbf16> to vector<128x128xbf16>
    %cst = arith.constant dense<0.000000e+00> : vector<128x128xf32>
    %4 = tpu.matmul %1, %3, %cst {dimension_numbers = #tpu.dot_dimension_numbers<[1], [0], [0], [1], [0, 0, 1, 1], [], []>} : vector<128x128xbf16>, vector<128x128xbf16>, vector<128x128xf32> -> vector<128x128xf32>
    %5 = arith.truncf %4 : vector<128x128xf32> to vector<128x128xbf16>
    %cst_6 = arith.constant dense<0.000000e+00> : vector<128x128xf32>
    %6 = tpu.matmul %0, %5, %cst_6 {dimension_numbers = #tpu.dot_dimension_numbers<[1], [0], [0], [1], [0, 0, 1, 1], [], []>} : vector<128x128xbf16>, vector<128x128xbf16>, vector<128x128xf32> -> vector<128x128xf32>
    %c0_7 = arith.constant 0 : index
    %c0_8 = arith.constant 0 : index
    %c0_9 = arith.constant 0 : index
    %7 = vector.load %arg4[%c0_7, %c0_8, %c0_9] : memref<2x1x128xf32, #tpu.memory_space<vmem>>, vector<1x1x128xf32>
    %8 = vector.shape_cast %7 : vector<1x1x128xf32> to vector<1x128xf32>
    %9 = vector.broadcast %8 : vector<1x128xf32> to vector<128x128xf32>
    %10 = arith.addf %6, %9 : vector<128x128xf32>
    %cst_10 = arith.constant 0.000000e+00 : f32
    %11 = vector.broadcast %cst_10 : f32 to vector<128x128xf32>
    %12 = arith.maximumf %10, %11 : vector<128x128xf32>
    %13 = arith.truncf %12 : vector<128x128xf32> to vector<128x128xbf16>
    %c1 = arith.constant 1 : index
    %c0_11 = arith.constant 0 : index
    %c0_12 = arith.constant 0 : index
    %14 = vector.load %arg3[%c1, %c0_11, %c0_12] : memref<2x128x128xbf16, #tpu.memory_space<vmem>>, vector<1x128x128xbf16>
    %15 = vector.shape_cast %14 : vector<1x128x128xbf16> to vector<128x128xbf16>
    %cst_13 = arith.constant dense<0.000000e+00> : vector<128x128xf32>
    %16 = tpu.matmul %13, %15, %cst_13 {dimension_numbers = #tpu.dot_dimension_numbers<[1], [0], [0], [1], [0, 0, 1, 1], [], []>} : vector<128x128xbf16>, vector<128x128xbf16>, vector<128x128xf32> -> vector<128x128xf32>
    %17 = arith.truncf %16 : vector<128x128xf32> to vector<128x128xbf16>
    %cst_14 = arith.constant dense<0.000000e+00> : vector<128x128xf32>
    %18 = tpu.matmul %0, %17, %cst_14 {dimension_numbers = #tpu.dot_dimension_numbers<[1], [0], [0], [1], [0, 0, 1, 1], [], []>} : vector<128x128xbf16>, vector<128x128xbf16>, vector<128x128xf32> -> vector<128x128xf32>
    %c1_15 = arith.constant 1 : index
    %c0_16 = arith.constant 0 : index
    %c0_17 = arith.constant 0 : index
    %19 = vector.load %arg4[%c1_15, %c0_16, %c0_17] : memref<2x1x128xf32, #tpu.memory_space<vmem>>, vector<1x1x128xf32>
    %20 = vector.shape_cast %19 : vector<1x1x128xf32> to vector<1x128xf32>
    %21 = vector.broadcast %20 : vector<1x128xf32> to vector<128x128xf32>
    %22 = arith.addf %18, %21 : vector<128x128xf32>
    %cst_18 = arith.constant 0.000000e+00 : f32
    %23 = vector.broadcast %cst_18 : f32 to vector<128x128xf32>
    %24 = arith.maximumf %22, %23 : vector<128x128xf32>
    %c0_19 = arith.constant 0 : index
    %c0_20 = arith.constant 0 : index
    %25 = vector.load %arg5[%c0_19, %c0_20] : memref<128x128xf32, #tpu.memory_space<vmem>>, vector<128x128xf32>
    tpu.vector_store %arg5[%c0_19, %c0_20], %24 {strides = array<i32>} : memref<128x128xf32, #tpu.memory_space<vmem>>, vector<128x128xf32>,
    return
  }
  func.func @transform_0(%arg0: i32) -> (i32, i32) {
    %c0_i32 = arith.constant 0 : i32
    %c0_i32_0 = arith.constant 0 : i32
    %c0_i32_1 = arith.constant 0 : i32
    return %c0_i32, %c0_i32_0 : i32, i32
  }
  func.func @transform_1(%arg0: i32) -> (i32, i32) {
    %c0_i32 = arith.constant 0 : i32
    %c0_i32_0 = arith.constant 0 : i32
    %c0_i32_1 = arith.constant 0 : i32
    return %c0_i32, %c0_i32_0 : i32, i32
  }
  func.func @transform_2(%arg0: i32) -> (i32, i32, i32) {
    %c0_i32 = arith.constant 0 : i32
    %c0_i32_0 = arith.constant 0 : i32
    %c0_i32_1 = arith.constant 0 : i32
    %c0_i32_2 = arith.constant 0 : i32
    return %c0_i32, %c0_i32_0, %c0_i32_1 : i32, i32, i32
  }
  func.func @transform_3(%arg0: i32) -> (i32, i32, i32) {
    %c0_i32 = arith.constant 0 : i32
    %c0_i32_0 = arith.constant 0 : i32
    %c0_i32_1 = arith.constant 0 : i32
    %c0_i32_2 = arith.constant 0 : i32
    return %c0_i32, %c0_i32_0, %c0_i32_1 : i32, i32, i32
  }
  func.func @transform_4(%arg0: i32) -> (i32, i32) {
    %c0_i32 = arith.constant 0 : i32
    %c0_i32_0 = arith.constant 0 : i32
    %c0_i32_1 = arith.constant 0 : i32
    return %c0_i32, %c0_i32_0 : i32, i32
  }
}

</mosaic_0001>

<bundles_post_ra>
// kernel: tpu_custom_call.1
= control target key start
LH: loop header
LB: loop body
LE: loop exit
PB: predicated region body
PF: predicated region fallthrough
CT: control target
= control target key end

     0   :  { %9 = vsyncpa [#allocation3], 0  ;;  %s1306_s0 = inlined_call_operand.hbm [shape: bf16[128,128], index: 0, kind: input, shape index: {}]   ;;  %s1307_s1 = inlined_call_operand.hbm [shape: bf16[128,128], index: 1, kind: input, shape index: {}]   ;;  %s1308_s2 = inlined_call_operand.hbm [shape: bf16[2,128,128], index: 2, kind: input, shape index: {}]   ;;  %s1309_s3 = inlined_call_operand.vmem [shape: f32[2,1,128], index: 3, kind: input, shape index: {}]   ;;  %s1310_s4 = inlined_call_operand.hbm [shape: f32[128,128], index: 4, kind: output, shape index: {}]  }
   0x1   :  { %10 = vsyncpa [#allocation6], 0 }
   0x2   :  { %11 = vsyncpa [#allocation4], 0  ;;  %s1171_s15 = smov [#allocation5]   ;;  %s1172_s17 = smov [#allocation2]  }
   0x3   :  { %s29_s16 = sshll.u32 %s1171_s15, 4  ;;  %s17_s18 = sshll.u32 %s1172_s17, 4  ;;  %s30_s16 = int_to_ptr.vmem [resolvable:$true] %s29_s16  ;;  %s1204_s18 = int_to_ptr.vmem [resolvable:$true] %s17_s18 }
   0x4   :  { %s1077_s21 = scalar_lea.hbm %s1307_s1, 1024 }
   0x5   :  { %p1078_p0 = scmp.ne.s32.totalorder %s1307_s1, %s1077_s21  ;;  %p1081_p1 = scmp.lt.u32.totalorder %s1077_s21, %s1307_s1 }
   0x7   :  { %p1083_p2 = pnand %p1081_p1, %p1078_p0 }
   0x9   :  { %1086 = shalt.err (!%p1083_p2)
}
   0xa   :  { %s1087_s26 = scalar_lea.vmem %s30_s16, 1024  ;;  %p1092_p4 = scmp.lt.s32.totalorder %s30_s16, %s30_s16 }
   0xb   :  { %p1088_p3 = scmp.ne.s32.totalorder %s30_s16, %s1087_s26  ;;  %p1093_p5 = scmp.lt.s32.totalorder %s1087_s26, %s1087_s26 }
   0xd   :  { %p1094_p6 = por %p1093_p5, %p1092_p4 }
   0xf   :  { %p1095_p7 = pnand %p1094_p6, %p1088_p3 }
  0x11   :  { %1098 = shalt.err (!%p1095_p7)
}
  0x12   :  { %s1173_s27 = smov 64   ;;  %s1174_s28 = smov 4  }
  0x13   :  { %35 = dma.hbm_to_vmem [thread:$0]  %s1307_s1, 1024, %s30_s16, [#allocation6], %s1173_s27, %s1173_s27, %s1174_s28  }
  0x14   :  { %s1099_s7 = scalar_lea.hbm %s1306_s0, 1024 }
  0x15   :  { %p1100_p8 = scmp.ne.s32.totalorder %s1306_s0, %s1099_s7  ;;  %p1103_p9 = scmp.lt.u32.totalorder %s1099_s7, %s1306_s0 }
  0x17   :  { %p1105_p10 = pnand %p1103_p9, %p1100_p8 }
  0x19   :  { %1108 = shalt.err (!%p1105_p10)
}
  0x1a   :  { %s1109_s12 = scalar_lea.vmem %s1204_s18, 1024  ;;  %p1114_p12 = scmp.lt.s32.totalorder %s1204_s18, %s1204_s18 }
  0x1b   :  { %p1110_p11 = scmp.ne.s32.totalorder %s1204_s18, %s1109_s12  ;;  %p1115_p13 = scmp.lt.s32.totalorder %s1109_s12, %s1109_s12 }
  0x1d   :  { %p1116_p0 = por %p1115_p13, %p1114_p12 }
  0x1f   :  { %p1117_p1 = pnand %p1116_p0, %p1110_p11 }
  0x21   :  { %1120 = shalt.err (!%p1117_p1)
}
  0x22   :  { %23 = dma.hbm_to_vmem [thread:$0]  %s1306_s0, 1024, %s1204_s18, [#allocation3], %s1173_s27, %s1173_s27, %s1174_s28  }
  0x23   :  { %s1175_s14 = smov [#allocation7]   ;;  %s1121_s19 = scalar_lea.hbm %s1308_s2, 2048 }
  0x24   :  { %s41_s15 = sshll.u32 %s1175_s14, 4  ;;  %p1122_p2 = scmp.ne.s32.totalorder %s1308_s2, %s1121_s19  ;;  %s42_s15 = int_to_ptr.vmem [resolvable:$true] %s41_s15 }
  0x25   :  { %p1125_p3 = scmp.lt.u32.totalorder %s1121_s19, %s1308_s2 }
  0x27   :  { %p1127_p4 = pnand %p1125_p3, %p1122_p2 }
  0x29   :  { %1130 = shalt.err (!%p1127_p4)
}
  0x2a   :  { %s1131_s24 = scalar_lea.vmem %s42_s15, 2048  ;;  %p1136_p6 = scmp.lt.s32.totalorder %s42_s15, %s42_s15 }
  0x2b   :  { %p1132_p5 = scmp.ne.s32.totalorder %s42_s15, %s1131_s24  ;;  %p1137_p7 = scmp.lt.s32.totalorder %s1131_s24, %s1131_s24 }
  0x2d   :  { %p1138_p8 = por %p1137_p7, %p1136_p6 }
  0x2f   :  { %p1139_p9 = pnand %p1138_p8, %p1132_p5 }
  0x31   :  { %1142 = shalt.err (!%p1139_p9)
}
  0x32   :  { %47 = dma.hbm_to_vmem [thread:$0]  %s1308_s2, 2048, %s42_s15, [#allocation6], %s1173_s27, %s1173_s27, %s1174_s28  }
  0x33   :  { %1165 = dma.done.wait [#allocation3], 1024  }
  0x34   :  { %1166 = vsyncadd [#allocation3], 4294966272 }
  0x35   :  { %1167 = dma.done.wait [#allocation6], 3072  }
  0x36   :  { %1168 = vsyncadd [#allocation6], 4294964224  ;;  %v1045_v0 = vld [vmem:[#allocation7] sm:$0xff]   ;;  %v1046_v1 = vld [vmem:[#allocation7 + $0x8] sm:$0xff]  }
  0x37   :  { %909 = vmatprep.subr.bf16.mxu0 %v1045_v0  ;;  %v1047_v2 = vld [vmem:[#allocation7 + $0x10] sm:$0xff]   ;;  %v1048_v3 = vld [vmem:[#allocation7 + $0x18] sm:$0xff]   ;;  %v1053_v4 = vld [vmem:[#allocation5] sm:$0xff]  }
  0x38   :  { %910 = vmatpush3.bf16.msra.mxu0 %v1045_v0  ;;  %925 = vmatprep.mubr.bf16.mxu0 %v1053_v4  ;;  %v1049_v5 = vld [vmem:[#allocation7 + $0x20] sm:$0xff]   ;;  %v1050_v6 = vld [vmem:[#allocation7 + $0x28] sm:$0xff]   ;;  %v1051_v7 = vld [vmem:[#allocation7 + $0x30] sm:$0xff]  }
  0x39   :  { %911 = vmatprep.subr.bf16.mxu0 %v1046_v1  ;;  %v1052_v8 = vld [vmem:[#allocation7 + $0x38] sm:$0xff]   ;;  %v1054_v9 = vld [vmem:[#allocation5 + $0x8] sm:$0xff]   ;;  %v1055_v10 = vld [vmem:[#allocation5 + $0x10] sm:$0xff]  }
  0x3a   :  { %v1056_v11 = vld [vmem:[#allocation5 + $0x18] sm:$0xff]   ;;  %v1057_v12 = vld [vmem:[#allocation5 + $0x20] sm:$0xff]   ;;  %v1058_v13 = vld [vmem:[#allocation5 + $0x28] sm:$0xff]  }
  0x3b   :  { %v1059_v14 = vld [vmem:[#allocation5 + $0x30] sm:$0xff]   ;;  %v1060_v15 = vld [vmem:[#allocation5 + $0x38] sm:$0xff]   ;;  %v1256_v16 = vld [vmem:[#allocation2] sm:$0xff]  }
  0x3c   :  { %912 = vmatpush3.bf16.msra.mxu0 %v1046_v1  ;;  %957 = vmatprep.mubr.bf16.mxu1 %v1256_v16  ;;  %v1069_v17 = vld [vmem:[#allocation7 + $0x40] sm:$0xff]   ;;  %v1070_v18 = vld [vmem:[#allocation7 + $0x48] sm:$0xff]   ;;  %v1071_v19 = vld [vmem:[#allocation7 + $0x50] sm:$0xff]  }
  0x3d   :  { %913 = vmatprep.subr.bf16.mxu0 %v1047_v2  ;;  %v1072_v20 = vld [vmem:[#allocation7 + $0x58] sm:$0xff]   ;;  %v1073_v21 = vld [vmem:[#allocation7 + $0x60] sm:$0xff]   ;;  %v1074_v22 = vld [vmem:[#allocation7 + $0x68] sm:$0xff]  }
  0x3e   :  { %v1259_v47 = vld [vmem:[#allocation2 + $0x8] sm:$0xff]   ;;  %v1261_v48 = vld [vmem:[#allocation2 + $0x10] sm:$0xff]   ;;  %v1265_v49 = vld [vmem:[#allocation2 + $0x18] sm:$0xff]  }
  0x3f   :  { %v1267_v50 = vld [vmem:[#allocation2 + $0x20] sm:$0xff]   ;;  %v1271_v51 = vld [vmem:[#allocation2 + $0x28] sm:$0xff]   ;;  %v1273_v52 = vld [vmem:[#allocation2 + $0x30] sm:$0xff]  }
  0x40   :  { %914 = vmatpush3.bf16.msra.mxu0 %v1047_v2  ;;  %v1277_v53 = vld [vmem:[#allocation2 + $0x38] sm:$0xff]   ;;  %v1075_v54 = vld [vmem:[#allocation7 + $0x70] sm:$0xff]   ;;  %v826_v56 = vld [vmem:[%s1309_s3] ss:$0 sm:$0xff] }
  0x41   :  { %915 = vmatprep.subr.bf16.mxu0 %v1048_v3  ;;  %v1076_v55 = vld [vmem:[#allocation7 + $0x78] sm:$0xff]  }
  0x44   :  { %916 = vmatpush3.bf16.msra.mxu0 %v1048_v3 }
  0x45   :  { %917 = vmatprep.subr.bf16.mxu0 %v1049_v5 }
  0x48   :  { %918 = vmatpush3.bf16.msra.mxu0 %v1049_v5 }
  0x49   :  { %919 = vmatprep.subr.bf16.mxu0 %v1050_v6 }
  0x4c   :  { %920 = vmatpush3.bf16.msra.mxu0 %v1050_v6 }
  0x4d   :  { %921 = vmatprep.subr.bf16.mxu0 %v1051_v7 }
  0x50   :  { %922 = vmatpush3.bf16.msra.mxu0 %v1051_v7 }
  0x51   :  { %923 = vmatprep.subr.bf16.mxu0 %v1052_v8 }
  0x54   :  { %924 = vmatpush3.bf16.msra.mxu0 %v1052_v8 }
  0x55   :  { %973 = vmatprep.subr.bf16.mxu0 %v1069_v17 }
  0x57   :  { %926 = vmatmul.mubr.bf16.vlgmr.msra.gmra.mrb[0].mxu0 %v1054_v9 }
  0x58   :  { %929 = vmatprep.mubr.bf16.mxu0 %v1055_v10  ;;  %974 = vmatpush3.bf16.msra.mxu0 %v1069_v17 }
  0x59   :  { %975 = vmatprep.subr.bf16.mxu0 %v1070_v18 }
  0x5c   :  { %976 = vmatpush3.bf16.msra.mxu0 %v1070_v18 }
  0x5d   :  { %977 = vmatprep.subr.bf16.mxu0 %v1071_v19 }
  0x5f   :  { %930 = vmatmul.mubr.bf16.gmra.mrb[4].mxu0 %v1056_v11 }
  0x60   :  { %933 = vmatprep.mubr.bf16.mxu0 %v1057_v12  ;;  %978 = vmatpush3.bf16.msra.mxu0 %v1071_v19 }
  0x61   :  { %979 = vmatprep.subr.bf16.mxu0 %v1072_v20 }
  0x64   :  { %980 = vmatpush3.bf16.msra.mxu0 %v1072_v20 }
  0x65   :  { %981 = vmatprep.subr.bf16.mxu0 %v1073_v21 }
  0x67   :  { %934 = vmatmul.mubr.bf16.gmra.mrb[8].mxu0 %v1058_v13 }
  0x68   :  { %937 = vmatprep.mubr.bf16.mxu0 %v1059_v14  ;;  %982 = vmatpush3.bf16.msra.mxu0 %v1073_v21 }
  0x69   :  { %983 = vmatprep.subr.bf16.mxu0 %v1074_v22 }
  0x6c   :  { %984 = vmatpush3.bf16.msra.mxu0 %v1074_v22 }
  0x6d   :  { %985 = vmatprep.subr.bf16.mxu0 %v1075_v54 }
  0x6f   :  { %938 = vmatmul.mubr.bf16.gmra.mrb[12].mxu0 %v1060_v15 }
  0x70   :  { %986 = vmatpush3.bf16.msra.mxu0 %v1075_v54 }
  0x71   :  { %987 = vmatprep.subr.bf16.mxu0 %v1076_v55 }
  0x74   :  { %988 = vmatpush3.bf16.msra.mxu0 %v1076_v55 }
 0x12a   :  { %v927_v23 = vpop.f32.mrb[0].mxu0 }
 0x12b   :  { %v238_v24 = vpop.f32.mrb[1].mxu0 }
 0x12c   :  { %v928_v25 = vpop.f32.mrb[2].mxu0 }
 0x12d   :  { %v302_v26 = vpack.c.bf16 %v928_v25, %v927_v23  ;;  %v241_v27 = vpop.f32.mrb[3].mxu0 }
 0x12e   :  { %v301_v28 = vpack.c.bf16 %v241_v27, %v238_v24 }
 0x130   :  { %941 = vmatprep.subr.bf16.mxu1 %v301_v28 }
 0x131   :  { %942 = vmatpush3.bf16.msra.mxu1 %v301_v28 }
 0x132   :  { %v931_v29 = vpop.f32.mrb[4].mxu0  ;;  %943 = vmatprep.subr.bf16.mxu1 %v302_v26 }
 0x133   :  { %v254_v30 = vpop.f32.mrb[5].mxu0 }
 0x134   :  { %v932_v31 = vpop.f32.mrb[6].mxu0 }
 0x135   :  { %v304_v32 = vpack.c.bf16 %v932_v31, %v931_v29  ;;  %v257_v33 = vpop.f32.mrb[7].mxu0  ;;  %944 = vmatpush3.bf16.msra.mxu1 %v302_v26 }
 0x136   :  { %v303_v34 = vpack.c.bf16 %v257_v33, %v254_v30 }
 0x138   :  { %945 = vmatprep.subr.bf16.mxu1 %v303_v34 }
 0x139   :  { %946 = vmatpush3.bf16.msra.mxu1 %v303_v34 }
 0x13a   :  { %v935_v35 = vpop.f32.mrb[8].mxu0  ;;  %947 = vmatprep.subr.bf16.mxu1 %v304_v32 }
 0x13b   :  { %v270_v36 = vpop.f32.mrb[9].mxu0 }
 0x13c   :  { %v936_v37 = vpop.f32.mrb[10].mxu0 }
 0x13d   :  { %v306_v38 = vpack.c.bf16 %v936_v37, %v935_v35  ;;  %v273_v39 = vpop.f32.mrb[11].mxu0  ;;  %948 = vmatpush3.bf16.msra.mxu1 %v304_v32 }
 0x13e   :  { %v305_v40 = vpack.c.bf16 %v273_v39, %v270_v36 }
 0x140   :  { %949 = vmatprep.subr.bf16.mxu1 %v305_v40 }
 0x141   :  { %950 = vmatpush3.bf16.msra.mxu1 %v305_v40 }
 0x142   :  { %v939_v41 = vpop.f32.mrb[12].mxu0  ;;  %951 = vmatprep.subr.bf16.mxu1 %v306_v38 }
 0x143   :  { %v286_v42 = vpop.f32.mrb[13].mxu0 }
 0x144   :  { %v940_v43 = vpop.f32.mrb[14].mxu0 }
 0x145   :  { %v308_v44 = vpack.c.bf16 %v940_v43, %v939_v41  ;;  %v289_v45 = vpop.f32.mrb[15].mxu0  ;;  %952 = vmatpush3.bf16.msra.mxu1 %v306_v38 }
 0x146   :  { %v307_v46 = vpack.c.bf16 %v289_v45, %v286_v42 }
 0x148   :  { %953 = vmatprep.subr.bf16.mxu1 %v307_v46 }
 0x149   :  { %954 = vmatpush3.bf16.msra.mxu1 %v307_v46 }
 0x14a   :  { %955 = vmatprep.subr.bf16.mxu1 %v308_v44 }
 0x14d   :  { %956 = vmatpush3.bf16.msra.mxu1 %v308_v44 }
 0x150   :  { %958 = vmatmul.mubr.bf16.vlgmr.msra.gmra.mrb[0].mxu1 %v1259_v47 }
 0x151   :  { %961 = vmatprep.mubr.bf16.mxu1 %v1261_v48 }
 0x158   :  { %962 = vmatmul.mubr.bf16.gmra.mrb[4].mxu1 %v1265_v49 }
 0x159   :  { %965 = vmatprep.mubr.bf16.mxu1 %v1267_v50 }
 0x160   :  { %966 = vmatmul.mubr.bf16.gmra.mrb[8].mxu1 %v1271_v51 }
 0x161   :  { %969 = vmatprep.mubr.bf16.mxu1 %v1273_v52 }
 0x168   :  { %970 = vmatmul.mubr.bf16.gmra.mrb[12].mxu1 %v1277_v53 }
 0x169   :  { %1021 = vmatprep.mubr.bf16.mxu1 %v1256_v16 }
 0x223   :  { %v959_v57 = vpop.f32.mrb[0].mxu1 }
 0x224   :  { %v407_v58 = vadd.f32 %v959_v57, %v826_v56  ;;  %v398_v59 = vpop.f32.mrb[1].mxu1 }
 0x225   :  { %v399_v60 = vadd.f32 %v826_v56, %v398_v59  ;;  %v960_v61 = vpop.f32.mrb[2].mxu1 }
 0x226   :  { %v410_v62 = vadd.f32 %v960_v61, %v826_v56  ;;  %v401_v63 = vpop.f32.mrb[3].mxu1  ;;  %v463_v1 = vmax.f32 %v407_v58, 0.0 }
 0x227   :  { %v402_v0 = vadd.f32 %v826_v56, %v401_v63  ;;  %v461_v3 = vmax.f32 %v399_v60, 0.0 }
 0x228   :  { %v464_v2 = vmax.f32 %v410_v62, 0.0 }
 0x229   :  { %v462_v4 = vmax.f32 %v402_v0, 0.0 }
 0x22a   :  { %v478_v5 = vpack.c.bf16 %v464_v2, %v463_v1 }
 0x22b   :  { %v477_v6 = vpack.c.bf16 %v462_v4, %v461_v3  ;;  %v963_v7 = vpop.f32.mrb[4].mxu1 }
 0x22c   :  { %v423_v8 = vadd.f32 %v963_v7, %v826_v56  ;;  %v414_v9 = vpop.f32.mrb[5].mxu1 }
 0x22d   :  { %v415_v10 = vadd.f32 %v826_v56, %v414_v9  ;;  %v964_v11 = vpop.f32.mrb[6].mxu1  ;;  %989 = vmatprep.mubr.bf16.mxu0 %v477_v6 }
 0x22e   :  { %v426_v12 = vadd.f32 %v964_v11, %v826_v56  ;;  %v417_v13 = vpop.f32.mrb[7].mxu1  ;;  %990 = vmatmul.mubr.bf16.vlgmr.msra.gmra.mrb[16].mxu0 %v478_v5  ;;  %v467_v15 = vmax.f32 %v423_v8, 0.0 }
 0x22f   :  { %v418_v14 = vadd.f32 %v826_v56, %v417_v13  ;;  %v465_v17 = vmax.f32 %v415_v10, 0.0 }
 0x230   :  { %v468_v16 = vmax.f32 %v426_v12, 0.0 }
 0x231   :  { %v466_v18 = vmax.f32 %v418_v14, 0.0 }
 0x232   :  { %v480_v19 = vpack.c.bf16 %v468_v16, %v467_v15  ;;  %v844_v16 = vld [vmem:[%s1309_s3 + $0x1] ss:$0 sm:$0xff]  ;;  %s1176_s3 = smov [#allocation8]  }
 0x233   :  { %v479_v20 = vpack.c.bf16 %v466_v18, %v465_v17  ;;  %v967_v21 = vpop.f32.mrb[8].mxu1  ;;  %s797_s28 = sshll.u32 %s1176_s3, 4  ;;  %s798_s28 = int_to_ptr.vmem [resolvable:$true] %s797_s28 }
 0x234   :  { %v439_v22 = vadd.f32 %v967_v21, %v826_v56  ;;  %v430_v23 = vpop.f32.mrb[9].mxu1  ;;  %s1143_s29 = scalar_lea.vmem %s798_s28, 2048  ;;  %p1148_p11 = scmp.lt.s32.totalorder %s798_s28, %s798_s28 }
 0x235   :  { %v431_v24 = vadd.f32 %v826_v56, %v430_v23  ;;  %v968_v25 = vpop.f32.mrb[10].mxu1  ;;  %993 = vmatprep.mubr.bf16.mxu0 %v479_v20  ;;  %p1144_p10 = scmp.ne.s32.totalorder %s798_s28, %s1143_s29  ;;  %p1149_p12 = scmp.lt.s32.totalorder %s1143_s29, %s1143_s29 }
 0x236   :  { %v442_v26 = vadd.f32 %v968_v25, %v826_v56  ;;  %v433_v27 = vpop.f32.mrb[11].mxu1  ;;  %994 = vmatmul.mubr.bf16.gmra.mrb[20].mxu0 %v480_v19  ;;  %v471_v29 = vmax.f32 %v439_v22, 0.0 }
 0x237   :  { %v434_v28 = vadd.f32 %v826_v56, %v433_v27  ;;  %v469_v31 = vmax.f32 %v431_v24, 0.0  ;;  %p1150_p13 = por %p1149_p12, %p1148_p11 }
 0x238   :  { %v472_v30 = vmax.f32 %v442_v26, 0.0 }
 0x239   :  { %v470_v32 = vmax.f32 %v434_v28, 0.0  ;;  %p1151_p0 = pnand %p1150_p13, %p1144_p10 }
 0x23a   :  { %v482_v33 = vpack.c.bf16 %v472_v30, %v471_v29 }
 0x23b   :  { %v481_v34 = vpack.c.bf16 %v470_v32, %v469_v31  ;;  %v971_v35 = vpop.f32.mrb[12].mxu1 }
 0x23c   :  { %v455_v36 = vadd.f32 %v971_v35, %v826_v56  ;;  %v446_v37 = vpop.f32.mrb[13].mxu1 }
 0x23d   :  { %v447_v38 = vadd.f32 %v826_v56, %v446_v37  ;;  %v972_v39 = vpop.f32.mrb[14].mxu1  ;;  %997 = vmatprep.mubr.bf16.mxu0 %v481_v34 }
 0x23e   :  { %v458_v40 = vadd.f32 %v972_v39, %v826_v56  ;;  %v449_v41 = vpop.f32.mrb[15].mxu1  ;;  %998 = vmatmul.mubr.bf16.gmra.mrb[24].mxu0 %v482_v33  ;;  %v475_v43 = vmax.f32 %v455_v36, 0.0 }
 0x23f   :  { %v450_v42 = vadd.f32 %v826_v56, %v449_v41  ;;  %v473_v45 = vmax.f32 %v447_v38, 0.0 }
 0x240   :  { %v476_v44 = vmax.f32 %v458_v40, 0.0 }
 0x241   :  { %v474_v46 = vmax.f32 %v450_v42, 0.0 }
 0x242   :  { %v484_v54 = vpack.c.bf16 %v476_v44, %v475_v43 }
 0x243   :  { %v483_v55 = vpack.c.bf16 %v474_v46, %v473_v45 }
 0x245   :  { %1001 = vmatprep.mubr.bf16.mxu0 %v483_v55 }
 0x246   :  { %1002 = vmatmul.mubr.bf16.gmra.mrb[28].mxu0 %v484_v54 }
 0x301   :  { %v991_v57 = vpop.f32.mrb[16].mxu0 }
 0x302   :  { %v584_v58 = vpop.f32.mrb[17].mxu0 }
 0x303   :  { %v992_v59 = vpop.f32.mrb[18].mxu0 }
 0x304   :  { %v648_v60 = vpack.c.bf16 %v992_v59, %v991_v57  ;;  %v587_v61 = vpop.f32.mrb[19].mxu0 }
 0x305   :  { %v647_v62 = vpack.c.bf16 %v587_v61, %v584_v58 }
 0x307   :  { %1005 = vmatprep.subr.bf16.mxu1 %v647_v62 }
 0x308   :  { %1006 = vmatpush3.bf16.msra.mxu1 %v647_v62 }
 0x309   :  { %v995_v63 = vpop.f32.mrb[20].mxu0  ;;  %1007 = vmatprep.subr.bf16.mxu1 %v648_v60 }
 0x30a   :  { %v600_v0 = vpop.f32.mrb[21].mxu0 }
 0x30b   :  { %v996_v56 = vpop.f32.mrb[22].mxu0 }
 0x30c   :  { %v650_v1 = vpack.c.bf16 %v996_v56, %v995_v63  ;;  %v603_v2 = vpop.f32.mrb[23].mxu0  ;;  %1008 = vmatpush3.bf16.msra.mxu1 %v648_v60 }
 0x30d   :  { %v649_v3 = vpack.c.bf16 %v603_v2, %v600_v0 }
 0x30f   :  { %1009 = vmatprep.subr.bf16.mxu1 %v649_v3 }
 0x310   :  { %1010 = vmatpush3.bf16.msra.mxu1 %v649_v3 }
 0x311   :  { %v999_v4 = vpop.f32.mrb[24].mxu0  ;;  %1011 = vmatprep.subr.bf16.mxu1 %v650_v1 }
 0x312   :  { %v616_v5 = vpop.f32.mrb[25].mxu0 }
 0x313   :  { %v1000_v6 = vpop.f32.mrb[26].mxu0 }
 0x314   :  { %v652_v7 = vpack.c.bf16 %v1000_v6, %v999_v4  ;;  %v619_v8 = vpop.f32.mrb[27].mxu0  ;;  %1012 = vmatpush3.bf16.msra.mxu1 %v650_v1 }
 0x315   :  { %v651_v9 = vpack.c.bf16 %v619_v8, %v616_v5 }
 0x317   :  { %1013 = vmatprep.subr.bf16.mxu1 %v651_v9 }
 0x318   :  { %1014 = vmatpush3.bf16.msra.mxu1 %v651_v9 }
 0x319   :  { %v1003_v10 = vpop.f32.mrb[28].mxu0  ;;  %1015 = vmatprep.subr.bf16.mxu1 %v652_v7 }
 0x31a   :  { %v632_v11 = vpop.f32.mrb[29].mxu0 }
 0x31b   :  { %v1004_v12 = vpop.f32.mrb[30].mxu0 }
 0x31c   :  { %v654_v13 = vpack.c.bf16 %v1004_v12, %v1003_v10  ;;  %v635_v14 = vpop.f32.mrb[31].mxu0  ;;  %1016 = vmatpush3.bf16.msra.mxu1 %v652_v7 }
 0x31d   :  { %v653_v15 = vpack.c.bf16 %v635_v14, %v632_v11 }
 0x31f   :  { %1017 = vmatprep.subr.bf16.mxu1 %v653_v15 }
 0x320   :  { %1018 = vmatpush3.bf16.msra.mxu1 %v653_v15 }
 0x321   :  { %1019 = vmatprep.subr.bf16.mxu1 %v654_v13 }
 0x324   :  { %1020 = vmatpush3.bf16.msra.mxu1 %v654_v13 }
 0x327   :  { %1022 = vmatmul.mubr.bf16.vlgmr.msra.gmra.mrb[16].mxu1 %v1259_v47 }
 0x328   :  { %1025 = vmatprep.mubr.bf16.mxu1 %v1261_v48 }
 0x32f   :  { %1026 = vmatmul.mubr.bf16.gmra.mrb[20].mxu1 %v1265_v49 }
 0x330   :  { %1029 = vmatprep.mubr.bf16.mxu1 %v1267_v50 }
 0x337   :  { %1030 = vmatmul.mubr.bf16.gmra.mrb[24].mxu1 %v1271_v51 }
 0x338   :  { %1033 = vmatprep.mubr.bf16.mxu1 %v1273_v52 }
 0x33f   :  { %1034 = vmatmul.mubr.bf16.gmra.mrb[28].mxu1 %v1277_v53 }
 0x3fa   :  { %v1023_v17 = vpop.f32.mrb[16].mxu1 }
 0x3fb   :  { %v706_v18 = vadd.f32 %v1023_v17, %v844_v16  ;;  %v697_v19 = vpop.f32.mrb[17].mxu1 }
 0x3fc   :  { %v698_v47 = vadd.f32 %v844_v16, %v697_v19  ;;  %v1024_v20 = vpop.f32.mrb[18].mxu1 }
 0x3fd   :  { %v762_v48 = vmax.f32 %v706_v18, 0.0  ;;  %v709_v21 = vadd.f32 %v1024_v20, %v844_v16  ;;  %v700_v49 = vpop.f32.mrb[19].mxu1 }
 0x3fe   :  { %v760_v22 = vmax.f32 %v698_v47, 0.0  ;;  %v701_v50 = vadd.f32 %v844_v16, %v700_v49 }
 0x3ff   :  { %778 = vst [vmem:[#allocation8 + $0x10] sm:$0xff] %v762_v48  ;;  %v763_v51 = vmax.f32 %v709_v21, 0.0 }
 0x400   :  { %776 = vst [vmem:[#allocation8] sm:$0xff] %v760_v22  ;;  %v761_v52 = vmax.f32 %v701_v50, 0.0 }
 0x401   :  { %779 = vst [vmem:[#allocation8 + $0x18] sm:$0xff] %v763_v51 }
 0x402   :  { %777 = vst [vmem:[#allocation8 + $0x8] sm:$0xff] %v761_v52  ;;  %v1027_v53 = vpop.f32.mrb[20].mxu1 }
 0x403   :  { %v722_v23 = vadd.f32 %v1027_v53, %v844_v16  ;;  %v713_v24 = vpop.f32.mrb[21].mxu1 }
 0x404   :  { %v714_v25 = vadd.f32 %v844_v16, %v713_v24  ;;  %v1028_v26 = vpop.f32.mrb[22].mxu1 }
 0x405   :  { %v766_v27 = vmax.f32 %v722_v23, 0.0  ;;  %v725_v28 = vadd.f32 %v1028_v26, %v844_v16  ;;  %v716_v29 = vpop.f32.mrb[23].mxu1 }
 0x406   :  { %v764_v30 = vmax.f32 %v714_v25, 0.0  ;;  %v717_v31 = vadd.f32 %v844_v16, %v716_v29 }
 0x407   :  { %782 = vst [vmem:[#allocation8 + $0x30] sm:$0xff] %v766_v27  ;;  %v767_v32 = vmax.f32 %v725_v28, 0.0 }
 0x408   :  { %780 = vst [vmem:[#allocation8 + $0x20] sm:$0xff] %v764_v30  ;;  %v765_v33 = vmax.f32 %v717_v31, 0.0 }
 0x409   :  { %783 = vst [vmem:[#allocation8 + $0x38] sm:$0xff] %v767_v32 }
 0x40a   :  { %781 = vst [vmem:[#allocation8 + $0x28] sm:$0xff] %v765_v33  ;;  %v1031_v34 = vpop.f32.mrb[24].mxu1 }
 0x40b   :  { %v738_v35 = vadd.f32 %v1031_v34, %v844_v16  ;;  %v729_v36 = vpop.f32.mrb[25].mxu1 }
 0x40c   :  { %v730_v37 = vadd.f32 %v844_v16, %v729_v36  ;;  %v1032_v38 = vpop.f32.mrb[26].mxu1 }
 0x40d   :  { %v770_v39 = vmax.f32 %v738_v35, 0.0  ;;  %v741_v40 = vadd.f32 %v1032_v38, %v844_v16  ;;  %v732_v41 = vpop.f32.mrb[27].mxu1 }
 0x40e   :  { %v768_v42 = vmax.f32 %v730_v37, 0.0  ;;  %v733_v43 = vadd.f32 %v844_v16, %v732_v41 }
 0x40f   :  { %786 = vst [vmem:[#allocation8 + $0x50] sm:$0xff] %v770_v39  ;;  %v771_v44 = vmax.f32 %v741_v40, 0.0 }
 0x410   :  { %784 = vst [vmem:[#allocation8 + $0x40] sm:$0xff] %v768_v42  ;;  %v769_v45 = vmax.f32 %v733_v43, 0.0 }
 0x411   :  { %787 = vst [vmem:[#allocation8 + $0x58] sm:$0xff] %v771_v44 }
 0x412   :  { %785 = vst [vmem:[#allocation8 + $0x48] sm:$0xff] %v769_v45  ;;  %v1035_v46 = vpop.f32.mrb[28].mxu1 }
 0x413   :  { %v754_v54 = vadd.f32 %v1035_v46, %v844_v16  ;;  %v745_v55 = vpop.f32.mrb[29].mxu1 }
 0x414   :  { %v746_v57 = vadd.f32 %v844_v16, %v745_v55  ;;  %v1036_v58 = vpop.f32.mrb[30].mxu1 }
 0x415   :  { %v774_v59 = vmax.f32 %v754_v54, 0.0  ;;  %v757_v60 = vadd.f32 %v1036_v58, %v844_v16  ;;  %v748_v61 = vpop.f32.mrb[31].mxu1 }
 0x416   :  { %v772_v62 = vmax.f32 %v746_v57, 0.0  ;;  %v749_v63 = vadd.f32 %v844_v16, %v748_v61 }
 0x417   :  { %790 = vst [vmem:[#allocation8 + $0x70] sm:$0xff] %v774_v59  ;;  %v775_v0 = vmax.f32 %v757_v60, 0.0 }
 0x418   :  { %788 = vst [vmem:[#allocation8 + $0x60] sm:$0xff] %v772_v62  ;;  %v773_v56 = vmax.f32 %v749_v63, 0.0 }
 0x419   :  { %791 = vst [vmem:[#allocation8 + $0x78] sm:$0xff] %v775_v0 }
 0x41a   :  { %789 = vst [vmem:[#allocation8 + $0x68] sm:$0xff] %v773_v56 }
 0x41b   :  { %1154 = shalt.err (!%p1151_p0)
}
 0x41c   :  { %s1155_s6 = scalar_lea.hbm %s1310_s4, 2048 }
 0x41d   :  { %p1156_p1 = scmp.ne.s32.totalorder %s1310_s4, %s1155_s6  ;;  %p1159_p2 = scmp.lt.u32.totalorder %s1155_s6, %s1310_s4 }
 0x41f   :  { %p1161_p3 = pnand %p1159_p2, %p1156_p1 }
 0x421   :  { %1164 = shalt.err (!%p1161_p3)
}
 0x422   :  { %s1177_s11 = smov 128   ;;  %s1178_s12 = smov 8  }
 0x423   :  { %803 = dma.vmem_to_hbm [thread:$0]  %s798_s28, 2048, %s1310_s4, [#allocation4], %s1177_s11, %s1177_s11, %s1178_s12  }
 0x424   :  { %1169 = dma.done.wait [#allocation4], 2048  }
 0x425   :  { %1170 = vsyncadd [#allocation4], 4294965248 }
 0x426   :  { %807 = vsyncpa [#allocation3], 1 }
 0x427   :  { %808 = vsyncpa [#allocation6], 1 }
 0x428   :  { %809 = vsyncpa [#allocation4], 1 }

</bundles_post_ra>
